<compile_context>
chip_gen: v7x
topology: tpu7x:2x2x1
jax: 0.10.0
libtpu: 0.0.40
codegen_flags: <defaults>
</compile_context>

<pallas_src>
import functools

import jax
import jax.numpy as jnp
import numpy as np
from jax.experimental import pallas as pl
from jax.experimental.pallas import tpu as pltpu

LANE = 128


def _round_up(n, m):
    return ((n + m - 1) // m) * m


def _tpu_vmem_capacity_bytes():
    """Physical VMEM of the local TPU; conservative (v7x-sized) fallback."""
    try:
        return pltpu.get_tpu_info().vmem_capacity_bytes
    except Exception:
        return 64 << 20


def _pick_tb(batch, tb):
    """Round the batch tile to sublanes and guarantee >= 2 grid steps when possible."""
    tb = max(8, _round_up(min(tb, batch), 8))
    # >= 2 grid steps whenever the batch can be split: lets the "parallel" batch
    # axis shard across both TensorCores on v7x (neutral on single-core chips).
    if batch >= 16 and pl.cdiv(batch, tb) < 2:
        tb = _round_up(pl.cdiv(batch, 2), 8)
    return tb


def bp_kernel(x_ref, w1_ref, b1_ref, w2_ref, b2_ref, w3_ref, o_ref, *, approx_rcp):
    """One batch tile of the fused 3-layer forward; weights stay VMEM-resident."""
    cdt = w1_ref.dtype                      # compute dtype of the MXU operands
    x = x_ref[...].astype(cdt)              # cast in-kernel (no wrapper HBM pass)

    def sigmoid(v):
        # 1 / (1 + exp(-v)): exp and the reciprocal both land on the EUP slot.
        return pl.reciprocal(1.0 + jnp.exp(-v), approx=approx_rcp)

    # layer 1: x @ w1 + b1 -> sigmoid   (fp32 accumulate / bias / activation)
    h1 = jnp.dot(x, w1_ref[...], preferred_element_type=jnp.float32)
    h1 = sigmoid(h1 + b1_ref[...])
    # layer 2: h1 @ w2 + b2 -> sigmoid
    h2 = jnp.dot(h1.astype(cdt), w2_ref[...], preferred_element_type=jnp.float32)
    h2 = sigmoid(h2 + b2_ref[...])
    # layer 3: h2 @ w3   (no bias, no activation -- matches the PyTorch forward)
    o_ref[...] = jnp.dot(h2.astype(cdt), w3_ref[...],
                         preferred_element_type=jnp.float32).astype(o_ref.dtype)


def bp_forward(x, w1, b1, w2, b2, w3, *, tb=None, compute_dtype=jnp.bfloat16):
    B, in_num = x.shape
    h1n = w1.shape[1]
    h2n = w2.shape[1]
    out_num = w3.shape[1]

    # Lane-pad the hidden widths to 128 so h1/h2 are full, unmasked vregs.
    # Padded *rows* of w2/w3 (the contraction dims) are zero, so the
    # sigmoid(0 + 0) = 0.5 garbage in padded hidden lanes contributes nothing.
    h1p = _round_up(h1n, LANE)
    h2p = _round_up(h2n, LANE)

    w1_p = jnp.zeros((in_num, h1p), compute_dtype).at[:, :h1n].set(w1.astype(compute_dtype))
    b1_p = jnp.zeros((1, h1p), jnp.float32).at[:, :h1n].set(b1.astype(jnp.float32))
    w2_p = jnp.zeros((h1p, h2p), compute_dtype).at[:h1n, :h2n].set(w2.astype(compute_dtype))
    b2_p = jnp.zeros((1, h2p), jnp.float32).at[:, :h2n].set(b2.astype(jnp.float32))
    # w3 keeps its real (narrow) output width: the out block is (tb, out_num),
    # so only the real 4 fp32 lanes per row ever hit HBM.
    w3_p = jnp.zeros((h2p, out_num), compute_dtype).at[:h2n, :].set(w3.astype(compute_dtype))

    # Chip-adaptive batch tile + scoped-VMEM limit (v7x has half the VMEM of v5e/v6e).
    vmem_cap = _tpu_vmem_capacity_bytes()
    big_vmem = vmem_cap >= (96 << 20)
    if tb is None:
        tb = 4096 if big_vmem else 2048
    tb = _pick_tb(B, tb)
    vmem_limit = (64 << 20) if big_vmem else (32 << 20)

    grid = (pl.cdiv(B, tb),)                 # ragged last block handled by Pallas
    pin = lambda i: (0, 0)                   # constant index_map -> stays resident

    kernel = functools.partial(
        bp_kernel,
        approx_rcp=(np.dtype(compute_dtype) != np.dtype(jnp.float32)),
    )

    return pl.pallas_call(
        kernel,
        out_shape=jax.ShapeDtypeStruct((B, out_num), jnp.float32),
        grid=grid,
        in_specs=[
            pl.BlockSpec((tb, in_num), lambda i: (i, 0)),   # x: tiled over batch
            pl.BlockSpec((in_num, h1p), pin),
            pl.BlockSpec((1, h1p), pin),
            pl.BlockSpec((h1p, h2p), pin),
            pl.BlockSpec((1, h2p), pin),
            pl.BlockSpec((h2p, out_num), pin),
        ],
        out_specs=pl.BlockSpec((tb, out_num), lambda i: (i, 0)),
        compiler_params=pltpu.CompilerParams(
            dimension_semantics=("parallel",),   # megacore batch sharding on v7x
            vmem_limit_bytes=vmem_limit,
        ),
    )(x, w1_p, b1_p, w2_p, b2_p, w3_p)


def _ref_forward(x, w1, b1, w2, b2, w3):
    h = jax.nn.sigmoid(x @ w1 + b1)
    h = jax.nn.sigmoid(h @ w2 + b2)
    return h @ w3


if __name__ == "__main__":
    # Module config: input_num=16, output_num=4, hidden_num_list=[10, 15], act='sigmoid'
    input_num, output_num = 16, 4
    h1_num, h2_num = 10, 15
    batch = 8

    key = jax.random.PRNGKey(0)
    kx, k1, kb1, k2, kb2, k3 = jax.random.split(key, 6)

    # torch.rand -> uniform [0, 1)
    x = jax.random.uniform(kx, (batch, input_num), dtype=jnp.float32)
    w1 = jax.random.uniform(k1, (input_num, h1_num), dtype=jnp.float32)
    b1 = jax.random.uniform(kb1, (1, h1_num), dtype=jnp.float32)
    w2 = jax.random.uniform(k2, (h1_num, h2_num), dtype=jnp.float32)
    b2 = jax.random.uniform(kb2, (1, h2_num), dtype=jnp.float32)
    w3 = jax.random.uniform(k3, (h2_num, output_num), dtype=jnp.float32)

    ref = _ref_forward(x, w1, b1, w2, b2, w3)

    # fp32 opt-in path, single tile.
    out_fp32 = bp_forward(x, w1, b1, w2, b2, w3, compute_dtype=jnp.float32)
    jax.block_until_ready(out_fp32)
    assert out_fp32.shape == (batch, output_num)
    assert jnp.allclose(out_fp32, ref, atol=1e-4, rtol=1e-4)

    # Default bf16-operand / fp32-accumulate path.
    out_bf16 = bp_forward(x, w1, b1, w2, b2, w3)
    jax.block_until_ready(out_bf16)
    assert out_bf16.shape == (batch, output_num)
    assert jnp.allclose(out_bf16, ref, atol=5e-2, rtol=5e-2)

    # Ragged multi-tile path: batch not a multiple of the tile, grid > 1 steps.
    batch2 = 300
    x2 = jax.random.uniform(jax.random.PRNGKey(1), (batch2, input_num), dtype=jnp.float32)
    ref2 = _ref_forward(x2, w1, b1, w2, b2, w3)

    out2_fp32 = bp_forward(x2, w1, b1, w2, b2, w3, tb=128, compute_dtype=jnp.float32)
    jax.block_until_ready(out2_fp32)
    assert out2_fp32.shape == (batch2, output_num)
    assert jnp.allclose(out2_fp32, ref2, atol=1e-4, rtol=1e-4)

    # Automatic tile selection (chip-adaptive tb, >= 2 grid steps) on the default path.
    out2_bf16 = bp_forward(x2, w1, b1, w2, b2, w3)
    jax.block_until_ready(out2_bf16)
    assert out2_bf16.shape == (batch2, output_num)
    assert jnp.allclose(out2_bf16, ref2, atol=5e-2, rtol=5e-2)

    print("KERNEL_OK")
</pallas_src>

<mosaic_0001>
module attributes {stable_mosaic.version = 11 : i64} {
  func.func @bp_kernel(%arg0: i32, %arg1: memref<8x16xf32, #tpu.memory_space<vmem>>, %arg2: memref<16x128xf32, #tpu.memory_space<vmem>>, %arg3: memref<1x128xf32, #tpu.memory_space<vmem>>, %arg4: memref<128x128xf32, #tpu.memory_space<vmem>>, %arg5: memref<1x128xf32, #tpu.memory_space<vmem>>, %arg6: memref<128x4xf32, #tpu.memory_space<vmem>>, %arg7: memref<8x4xf32, #tpu.memory_space<vmem>>) attributes {dimension_semantics = [#tpu.dimension_semantics<parallel>], iteration_bounds = array<i64: 1>, scalar_prefetch = 0 : i64, scratch_operands = 0 : i64, tpu.core_type = #tpu.core_type<tc>, window_params = [{transform_indices = @transform_0, window_bounds = array<i64: 8, 16>}, {pipeline_mode = #tpu.pipeline_mode<synchronous>, transform_indices = @transform_1, window_bounds = array<i64: 16, 128>}, {pipeline_mode = #tpu.pipeline_mode<synchronous>, transform_indices = @transform_2, window_bounds = array<i64: 1, 128>}, {pipeline_mode = #tpu.pipeline_mode<synchronous>, transform_indices = @transform_3, window_bounds = array<i64: 128, 128>}, {pipeline_mode = #tpu.pipeline_mode<synchronous>, transform_indices = @transform_4, window_bounds = array<i64: 1, 128>}, {pipeline_mode = #tpu.pipeline_mode<synchronous>, transform_indices = @transform_5, window_bounds = array<i64: 128, 4>}, {transform_indices = @transform_6, window_bounds = array<i64: 8, 4>}]} {
    %c0 = arith.constant 0 : index
    %c0_0 = arith.constant 0 : index
    %0 = vector.load %arg1[%c0, %c0_0] : memref<8x16xf32, #tpu.memory_space<vmem>>, vector<8x16xf32>
    %c0_1 = arith.constant 0 : index
    %c0_2 = arith.constant 0 : index
    %1 = vector.load %arg2[%c0_1, %c0_2] : memref<16x128xf32, #tpu.memory_space<vmem>>, vector<16x128xf32>
    %cst = arith.constant dense<0.000000e+00> : vector<8x128xf32>
    %2 = tpu.matmul %0, %1, %cst {dimension_numbers = #tpu.dot_dimension_numbers<[1], [0], [0], [1], [0, 0, 1, 1], [], []>} : vector<8x16xf32>, vector<16x128xf32>, vector<8x128xf32> -> vector<8x128xf32>
    %c0_3 = arith.constant 0 : index
    %c0_4 = arith.constant 0 : index
    %3 = vector.load %arg3[%c0_3, %c0_4] : memref<1x128xf32, #tpu.memory_space<vmem>>, vector<1x128xf32>
    %4 = vector.broadcast %3 : vector<1x128xf32> to vector<8x128xf32>
    %5 = arith.addf %2, %4 : vector<8x128xf32>
    %cst_5 = arith.constant 0.000000e+00 : f32
    %6 = vector.broadcast %cst_5 : f32 to vector<8x128xf32>
    %7 = arith.subf %6, %5 : vector<8x128xf32>
    %8 = math.exp %7 : vector<8x128xf32>
    %cst_6 = arith.constant 1.000000e+00 : f32
    %9 = vector.broadcast %cst_6 : f32 to vector<8x128xf32>
    %10 = arith.addf %9, %8 : vector<8x128xf32>
    %11 = tpu.reciprocal %10 : vector<8x128xf32> -> vector<8x128xf32>
    %c0_7 = arith.constant 0 : index
    %c0_8 = arith.constant 0 : index
    %12 = vector.load %arg4[%c0_7, %c0_8] : memref<128x128xf32, #tpu.memory_space<vmem>>, vector<128x128xf32>
    %cst_9 = arith.constant dense<0.000000e+00> : vector<8x128xf32>
    %13 = tpu.matmul %11, %12, %cst_9 {dimension_numbers = #tpu.dot_dimension_numbers<[1], [0], [0], [1], [0, 0, 1, 1], [], []>} : vector<8x128xf32>, vector<128x128xf32>, vector<8x128xf32> -> vector<8x128xf32>
    %c0_10 = arith.constant 0 : index
    %c0_11 = arith.constant 0 : index
    %14 = vector.load %arg5[%c0_10, %c0_11] : memref<1x128xf32, #tpu.memory_space<vmem>>, vector<1x128xf32>
    %15 = vector.broadcast %14 : vector<1x128xf32> to vector<8x128xf32>
    %16 = arith.addf %13, %15 : vector<8x128xf32>
    %cst_12 = arith.constant 0.000000e+00 : f32
    %17 = vector.broadcast %cst_12 : f32 to vector<8x128xf32>
    %18 = arith.subf %17, %16 : vector<8x128xf32>
    %19 = math.exp %18 : vector<8x128xf32>
    %cst_13 = arith.constant 1.000000e+00 : f32
    %20 = vector.broadcast %cst_13 : f32 to vector<8x128xf32>
    %21 = arith.addf %20, %19 : vector<8x128xf32>
    %22 = tpu.reciprocal %21 : vector<8x128xf32> -> vector<8x128xf32>
    %c0_14 = arith.constant 0 : index
    %c0_15 = arith.constant 0 : index
    %23 = vector.load %arg6[%c0_14, %c0_15] : memref<128x4xf32, #tpu.memory_space<vmem>>, vector<128x4xf32>
    %cst_16 = arith.constant dense<0.000000e+00> : vector<8x4xf32>
    %24 = tpu.matmul %22, %23, %cst_16 {dimension_numbers = #tpu.dot_dimension_numbers<[1], [0], [0], [1], [0, 0, 1, 1], [], []>} : vector<8x128xf32>, vector<128x4xf32>, vector<8x4xf32> -> vector<8x4xf32>
    %c0_17 = arith.constant 0 : index
    %c0_18 = arith.constant 0 : index
    %25 = vector.load %arg7[%c0_17, %c0_18] : memref<8x4xf32, #tpu.memory_space<vmem>>, vector<8x4xf32>
    tpu.vector_store %arg7[%c0_17, %c0_18], %24 {strides = array<i32>} : memref<8x4xf32, #tpu.memory_space<vmem>>, vector<8x4xf32>,
    return
  }
  func.func @transform_0(%arg0: i32) -> (i32, i32) {
    %c0_i32 = arith.constant 0 : i32
    %c0_i32_0 = arith.constant 0 : i32
    return %arg0, %c0_i32 : i32, i32
  }
  func.func @transform_1(%arg0: i32) -> (i32, i32) {
    %c0_i32 = arith.constant 0 : i32
    %c0_i32_0 = arith.constant 0 : i32
    %c0_i32_1 = arith.constant 0 : i32
    return %c0_i32, %c0_i32_0 : i32, i32
  }
  func.func @transform_2(%arg0: i32) -> (i32, i32) {
    %c0_i32 = arith.constant 0 : i32
    %c0_i32_0 = arith.constant 0 : i32
    %c0_i32_1 = arith.constant 0 : i32
    return %c0_i32, %c0_i32_0 : i32, i32
  }
  func.func @transform_3(%arg0: i32) -> (i32, i32) {
    %c0_i32 = arith.constant 0 : i32
    %c0_i32_0 = arith.constant 0 : i32
    %c0_i32_1 = arith.constant 0 : i32
    return %c0_i32, %c0_i32_0 : i32, i32
  }
  func.func @transform_4(%arg0: i32) -> (i32, i32) {
    %c0_i32 = arith.constant 0 : i32
    %c0_i32_0 = arith.constant 0 : i32
    %c0_i32_1 = arith.constant 0 : i32
    return %c0_i32, %c0_i32_0 : i32, i32
  }
  func.func @transform_5(%arg0: i32) -> (i32, i32) {
    %c0_i32 = arith.constant 0 : i32
    %c0_i32_0 = arith.constant 0 : i32
    %c0_i32_1 = arith.constant 0 : i32
    return %c0_i32, %c0_i32_0 : i32, i32
  }
  func.func @transform_6(%arg0: i32) -> (i32, i32) {
    %c0_i32 = arith.constant 0 : i32
    %c0_i32_0 = arith.constant 0 : i32
    return %arg0, %c0_i32 : i32, i32
  }
}

</mosaic_0001>

<bundles_post_ra>
// kernel: tpu_custom_call.1
= control target key start
LH: loop header
LB: loop body
LE: loop exit
PB: predicated region body
PF: predicated region fallthrough
CT: control target
= control target key end

     0   :  { %11 = vsyncpa [#allocation3], 0  ;;  %s523_s21 = smov [#allocation2]   ;;  %s701_s0 = inlined_call_operand.vmem [shape: f32[8,16], index: 0, kind: input, shape index: {}]   ;;  %s702_s1 = inlined_call_operand.hbm [shape: f32[16,128], index: 1, kind: input, shape index: {}]   ;;  %s703_s2 = inlined_call_operand.vmem [shape: f32[1,128], index: 2, kind: input, shape index: {}]   ;;  %s704_s3 = inlined_call_operand.vmem [shape: f32[128,128], index: 3, kind: input, shape index: {}]   ;;  %s705_s4 = inlined_call_operand.vmem [shape: f32[1,128], index: 4, kind: input, shape index: {}]   ;;  %s706_s5 = inlined_call_operand.vmem [shape: f32[128,4], index: 5, kind: input, shape index: {}]   ;;  %s707_s6 = inlined_call_operand.vmem [shape: f32[8,4], index: 6, kind: output, shape index: {}]  }
   0x1   :  { %s19_s22 = sshll.u32 %s523_s21, 4  ;;  %s499_s25 = scalar_lea.hbm %s702_s1, 256  ;;  %s20_s22 = int_to_ptr.vmem [resolvable:$true] %s19_s22 }
   0x2   :  { %p500_p0 = scmp.ne.s32.totalorder %s702_s1, %s499_s25  ;;  %p503_p1 = scmp.lt.u32.totalorder %s499_s25, %s702_s1 }
   0x4   :  { %p505_p2 = pnand %p503_p1, %p500_p0 }
   0x6   :  { %508 = shalt.err (!%p505_p2)
}
   0x7   :  { %s509_s30 = scalar_lea.vmem %s20_s22, 256  ;;  %p514_p4 = scmp.lt.s32.totalorder %s20_s22, %s20_s22 }
   0x8   :  { %p510_p3 = scmp.ne.s32.totalorder %s20_s22, %s509_s30  ;;  %p515_p5 = scmp.lt.s32.totalorder %s509_s30, %s509_s30 }
   0xa   :  { %p516_p6 = por %p515_p5, %p514_p4 }
   0xc   :  { %p517_p7 = pnand %p516_p6, %p510_p3 }
   0xe   :  { %520 = shalt.err (!%p517_p7)
}
   0xf   :  { %s524_s7 = smov 128   ;;  %s525_s8 = smov 8  }
  0x10   :  { %25 = dma.hbm_to_vmem [thread:$0]  %s702_s1, 256, %s20_s22, [#allocation3], %s524_s7, %s524_s7, %s525_s8  }
  0x11   :  { %521 = dma.done.wait [#allocation3], 256  }
  0x12   :  { %522 = vsyncadd [#allocation3], 4294967040  ;;  %v526_v0 = vmov 0.0|0.0   ;;  %vm527_vm0 = vmmov 0   ;;  %v528_v1 = vmov 0.0   ;;  %v38_v2 = vld [vmem:[#allocation2] sm:$0xff] }
  0x13   :  { %434 = vmatprep.subr.bf16.mxu0 %v526_v0  ;;  %361 = vmatprep.mubr.msk.f32.mxu0 %vm527_vm0, %v528_v1  ;;  %v39_v3 = vld [vmem:[#allocation2 + $0x8] sm:$0xff]  ;;  %v37_v5 = vld [vmem:[%s701_s0] sm:$0xff]  ;;  %vm47_vm1 = vcmask 130048   ;;  %v128_v9 = vld [vmem:[%s704_s3 + $0x10] sm:$0xff]  ;;  %vm310_vm2 = vcmask 31744  }
  0x14   :  { %437 = vmatprep.subr.bf16.mxu1 %v526_v0  ;;  %396 = vmatprep.mubr.msk.f32.mxu1 %vm527_vm0, %v528_v1  ;;  %v435_v4 = vpack.c.bf16 %v39_v3, %v38_v2  ;;  %v126_v6 = vld [vmem:[%s704_s3] sm:$0xff]  ;;  %v127_v7 = vld [vmem:[%s704_s3 + $0x8] sm:$0xff]  ;;  %v129_v10 = vld [vmem:[%s704_s3 + $0x18] sm:$0xff] }
  0x15   :  { %v438_v8 = vpack.c.bf16 %v127_v7, %v126_v6  ;;  %v441_v11 = vpack.c.bf16 %v129_v10, %v128_v9  ;;  %v130_v12 = vld [vmem:[%s704_s3 + $0x20] sm:$0xff]  ;;  %v131_v13 = vld [vmem:[%s704_s3 + $0x28] sm:$0xff]  ;;  %v132_v15 = vld [vmem:[%s704_s3 + $0x30] sm:$0xff] }
  0x16   :  { %436 = vmatpush3.bf16.msra.mxu0 %v435_v4  ;;  %v444_v14 = vpack.c.bf16 %v131_v13, %v130_v12  ;;  %v133_v16 = vld [vmem:[%s704_s3 + $0x38] sm:$0xff]  ;;  %v134_v18 = vld [vmem:[%s704_s3 + $0x40] sm:$0xff]  ;;  %v135_v19 = vld [vmem:[%s704_s3 + $0x48] sm:$0xff] }
  0x17   :  { %461 = vmatprep.subr.bf16.mxu0 %v526_v0  ;;  %439 = vmatpush3.bf16.msra.mxu1 %v438_v8  ;;  %v447_v17 = vpack.c.bf16 %v133_v16, %v132_v15  ;;  %v450_v20 = vpack.c.bf16 %v135_v19, %v134_v18  ;;  %v136_v21 = vld [vmem:[%s704_s3 + $0x50] sm:$0xff]  ;;  %v137_v22 = vld [vmem:[%s704_s3 + $0x58] sm:$0xff]  ;;  %v138_v24 = vld [vmem:[%s704_s3 + $0x60] sm:$0xff] }
  0x18   :  { %440 = vmatprep.subr.bf16.mxu1 %v526_v0  ;;  %v453_v23 = vpack.c.bf16 %v137_v22, %v136_v21  ;;  %v139_v25 = vld [vmem:[%s704_s3 + $0x68] sm:$0xff]  ;;  %v140_v27 = vld [vmem:[%s704_s3 + $0x70] sm:$0xff]  ;;  %v141_v28 = vld [vmem:[%s704_s3 + $0x78] sm:$0xff] }
  0x19   :  { %362 = vmatmul.mubr.msk.f32.vlgmr.msra.gmra.mrb[0].mxu0 %vm47_vm1, %v37_v5  ;;  %v456_v26 = vpack.c.bf16 %v139_v25, %v138_v24  ;;  %v459_v29 = vpack.c.bf16 %v141_v28, %v140_v27  ;;  %v317_v30 = vld [vmem:[%s703_s2] ss:$0 sm:$0xff]  ;;  %v225_v40 = vld [vmem:[%s706_s5 + $0x8] sm:$0xff]  ;;  %v226_v42 = vld [vmem:[%s706_s5 + $0x10] sm:$0xff] }
  0x1a   :  { %431 = vmatprep.mubr.msk.f32.mxu0 %vm527_vm0, %v528_v1  ;;  %v224_v39 = vld [vmem:[%s706_s5] sm:$0xff]  ;;  %v227_v43 = vld [vmem:[%s706_s5 + $0x18] sm:$0xff]  ;;  %v229_v46 = vld [vmem:[%s706_s5 + $0x28] sm:$0xff] }
  0x1b   :  { %442 = vmatpush3.bf16.msra.mxu1 %v441_v11  ;;  %v462_v41 = vpack.c.bf16 %v225_v40, %v224_v39  ;;  %v465_v44 = vpack.c.bf16 %v227_v43, %v226_v42  ;;  %v228_v45 = vld [vmem:[%s706_s5 + $0x20] sm:$0xff]  ;;  %v230_v48 = vld [vmem:[%s706_s5 + $0x30] sm:$0xff]  ;;  %v231_v49 = vld [vmem:[%s706_s5 + $0x38] sm:$0xff] }
  0x1c   :  { %443 = vmatprep.subr.bf16.mxu1 %v526_v0  ;;  %v468_v47 = vpack.c.bf16 %v229_v46, %v228_v45  ;;  %v471_v50 = vpack.c.bf16 %v231_v49, %v230_v48  ;;  %v232_v51 = vld [vmem:[%s706_s5 + $0x40] sm:$0xff]  ;;  %v233_v52 = vld [vmem:[%s706_s5 + $0x48] sm:$0xff]  ;;  %v234_v54 = vld [vmem:[%s706_s5 + $0x50] sm:$0xff] }
  0x1d   :  { %463 = vmatpush3.bf16.msra.mxu0 %v462_v41  ;;  %v474_v53 = vpack.c.bf16 %v233_v52, %v232_v51  ;;  %v235_v55 = vld [vmem:[%s706_s5 + $0x58] sm:$0xff]  ;;  %v236_v57 = vld [vmem:[%s706_s5 + $0x60] sm:$0xff]  ;;  %v237_v58 = vld [vmem:[%s706_s5 + $0x68] sm:$0xff] }
  0x1e   :  { %464 = vmatprep.subr.bf16.mxu0 %v526_v0  ;;  %v477_v56 = vpack.c.bf16 %v235_v55, %v234_v54  ;;  %v480_v59 = vpack.c.bf16 %v237_v58, %v236_v57  ;;  %v238_v60 = vld [vmem:[%s706_s5 + $0x70] sm:$0xff]  ;;  %v239_v61 = vld [vmem:[%s706_s5 + $0x78] sm:$0xff]  ;;  %v319_v63 = vld [vmem:[%s705_s4] ss:$0 sm:$0xff] }
  0x1f   :  { %445 = vmatpush3.bf16.msra.mxu1 %v444_v14  ;;  %v483_v62 = vpack.c.bf16 %v239_v61, %v238_v60 }
  0x20   :  { %446 = vmatprep.subr.bf16.mxu1 %v526_v0 }
  0x21   :  { %466 = vmatpush3.bf16.msra.mxu0 %v465_v44 }
  0x22   :  { %467 = vmatprep.subr.bf16.mxu0 %v526_v0 }
  0x23   :  { %448 = vmatpush3.bf16.msra.mxu1 %v447_v17 }
  0x24   :  { %449 = vmatprep.subr.bf16.mxu1 %v526_v0 }
  0x25   :  { %469 = vmatpush3.bf16.msra.mxu0 %v468_v47 }
  0x26   :  { %470 = vmatprep.subr.bf16.mxu0 %v526_v0 }
  0x27   :  { %451 = vmatpush3.bf16.msra.mxu1 %v450_v20 }
  0x28   :  { %452 = vmatprep.subr.bf16.mxu1 %v526_v0 }
  0x29   :  { %472 = vmatpush3.bf16.msra.mxu0 %v471_v50 }
  0x2a   :  { %473 = vmatprep.subr.bf16.mxu0 %v526_v0 }
  0x2b   :  { %454 = vmatpush3.bf16.msra.mxu1 %v453_v23 }
  0x2c   :  { %455 = vmatprep.subr.bf16.mxu1 %v526_v0 }
  0x2d   :  { %475 = vmatpush3.bf16.msra.mxu0 %v474_v53 }
  0x2e   :  { %476 = vmatprep.subr.bf16.mxu0 %v526_v0 }
  0x2f   :  { %457 = vmatpush3.bf16.msra.mxu1 %v456_v26 }
  0x30   :  { %458 = vmatprep.subr.bf16.mxu1 %v526_v0 }
  0x31   :  { %478 = vmatpush3.bf16.msra.mxu0 %v477_v56 }
  0x32   :  { %479 = vmatprep.subr.bf16.mxu0 %v526_v0 }
  0x33   :  { %460 = vmatpush3.bf16.msra.mxu1 %v459_v29 }
  0x35   :  { %481 = vmatpush3.bf16.msra.mxu0 %v480_v59 }
  0x36   :  { %482 = vmatprep.subr.bf16.mxu0 %v526_v0 }
  0x39   :  { %484 = vmatpush3.bf16.msra.mxu0 %v483_v62 }
  0xec   :  { %v117_v31 = vpop.f32.mrb[0].mxu0 }
  0xed   :  { %v118_v32 = vadd.f32 %v317_v30, %v117_v31  ;;  %v363_v33 = vpop.f32.mrb[1].mxu0 }
  0xef   :  { %v121_v34 = vsub.f32 0.0, %v118_v32 }
  0xf1   :  { %v122_v35 = vmul.f32 1.442695, %v121_v34 }
  0xf3   :  { %491 = vpow2.f32 %v122_v35 }
  0xfd   :  { %v492_v36 = vpop.eup %491 }
  0xfe   :  { %v124_v37 = vadd.f32 1.0, %v492_v36 }
 0x100   :  { %493 = vrcp.f32 %v124_v37 }
 0x10a   :  { %v494_v38 = vpop.eup %493 }
 0x10b   :  { %397 = vmatmul.mubr.f32.vlgmr.msra.gmra.mrb[0].mxu1 %v494_v38 }
 0x1de   :  { %v215_v1 = vpop.f32.mrb[0].mxu1 }
 0x1df   :  { %v216_v2 = vadd.f32 %v319_v63, %v215_v1  ;;  %v398_v3 = vpop.f32.mrb[1].mxu1 }
 0x1e1   :  { %v219_v4 = vsub.f32 0.0, %v216_v2 }
 0x1e3   :  { %v220_v5 = vmul.f32 1.442695, %v219_v4 }
 0x1e5   :  { %495 = vpow2.f32 %v220_v5 }
 0x1ef   :  { %v496_v6 = vpop.eup %495 }
 0x1f0   :  { %v222_v7 = vadd.f32 1.0, %v496_v6 }
 0x1f2   :  { %497 = vrcp.f32 %v222_v7 }
 0x1fc   :  { %v498_v8 = vpop.eup %497 }
 0x1fd   :  { %432 = vmatmul.mubr.f32.vlgmr.msra.gmra.mrb[2].mxu0 %v498_v8 }
 0x2d0   :  { %v306_v9 = vpop.f32.mrb[2].mxu0 }
 0x2d1   :  { %311 = vst.msk [vmem:[%s707_s6] sm:$0xff] %vm310_vm2, %v306_v9  ;;  %v433_v0 = vpop.f32.mrb[3].mxu0 }
 0x2d2   :  { %316 = vsyncpa [#allocation3], 1 }

</bundles_post_ra>
